<compile_context>
chip_gen: v7x
topology: tpu7x:2x2x1
jax: 0.10.0
libtpu: 0.0.40
codegen_flags: <defaults>
</compile_context>

<pallas_src>
import functools

import jax
import jax.numpy as jnp
from jax.experimental import pallas as pl
from jax.experimental.pallas import tpu as pltpu


def img_gcn_kernel(h_ref, attn_ref, attn_row_ref, adj_ref, att_e_ref, rel_ref,
                   wn_ref, bn_ref, wr_ref, br_ref,
                   wa1_ref, wa2_ref, wa3_ref, ba_ref,
                   out_ref, *, tile_dst):
    f32 = jnp.float32
    d0 = pl.multiple_of(pl.program_id(0) * tile_dst, tile_dst)

    h_all = h_ref[...]                 # [N, Din]
    attn_all = attn_ref[...]           # [N, 1]
    attn_row = attn_row_ref[...]       # [1, N]   (lane-major copy of att_n)

    adj = adj_ref[...]                 # [T, N]   adj[dst, src] in {0, 1}
    att_e = att_e_ref[...]             # [T, N]   per-edge attention (dst, src)
    w_e = adj * att_e                  # [T, N]   edge weights, 0 off-edges

    # --- z1 = sum_src adj * (src.att * node_fc(src.h)); node_fc hoisted ----
    agg_h = jnp.dot(adj, attn_all * h_all,
                    preferred_element_type=f32)                           # [T, Din]
    deg_a = jnp.sum(adj * attn_row, axis=-1, keepdims=True)               # [T, 1]
    z1 = (jnp.dot(agg_h, wn_ref[...], preferred_element_type=f32)
          + deg_a * bn_ref[...])                                          # [T, Din]

    # --- z2 = sum_src w_e * rel_fc(rel); rel_fc hoisted past the reduction -
    # VPU broadcast-multiply + XLU src-axis reduce (no selection matmuls).
    rel_agg = jnp.sum(rel_ref[...] * w_e[:, :, None], axis=1)             # [T, Drel]
    deg_w = jnp.sum(w_e, axis=-1, keepdims=True)                          # [T, 1]
    z2 = (jnp.dot(rel_agg, wr_ref[...], preferred_element_type=f32)
          + deg_w * br_ref[...])                                          # [T, Drel]

    # --- node_fc on the dst rows only (sliced from the resident full arrays)
    h_dst = h_ref[pl.ds(d0, tile_dst), :]                                 # [T, Din]
    attn_dst = attn_ref[pl.ds(d0, tile_dst), :]                           # [T, 1]
    h_new_dst = (jnp.dot(h_dst, wn_ref[...], preferred_element_type=f32)
                 + bn_ref[...])                                           # [T, Din]

    # --- reduce/apply: h = dst.att * relu(apply_fc([z1 | z2 | h_new])) ----
    # apply_fc split column-block-wise so no lane-concatenate is needed.
    o = (jnp.dot(z1, wa1_ref[...], preferred_element_type=f32)
         + jnp.dot(z2, wa2_ref[...], preferred_element_type=f32)
         + jnp.dot(h_new_dst, wa3_ref[...], preferred_element_type=f32)
         + ba_ref[...])
    out_ref[...] = attn_dst * jnp.maximum(o, 0.0)


def _pick_tile_dst(n, drel, *, cap=256, rel_vmem_budget=8 << 20):
    """Largest divisor of n (<= cap) whose double-buffered rel block fits the budget."""
    best = None
    for t in range(1, min(n, cap) + 1):
        if n % t:
            continue
        if not (t == n or t % 8 == 0):
            continue
        if 2 * t * n * drel * 4 > rel_vmem_budget:
            continue
        best = t
    return best if best is not None else n


def image_gcn_layer(h, att_n, adj, att_e, rel_dense, params, *, tile_dst=None):
    """h:[N,Din] att_n:[N,1] adj:[N,N] att_e:[N,N] rel_dense:[N,N,Drel] -> [N,Dout]."""
    n, din = h.shape
    drel = rel_dense.shape[-1]
    wn, bn, wr, br, wa, ba = (params["wn"], params["bn"], params["wr"],
                              params["br"], params["wa"], params["ba"])
    dout = wa.shape[0]

    if tile_dst is None:
        tile_dst = _pick_tile_dst(n, drel)
    tile_dst = min(tile_dst, n)
    assert n % tile_dst == 0, "dst tiling requires N % tile_dst == 0"
    assert tile_dst == n or tile_dst % 8 == 0, "sublane tile must be x8 or full"

    # Glue: pre-transpose Linear weights (PyTorch stores [out, in]) and split
    # apply_fc by the concat blocks [z1 (Din) | z2 (Drel) | h (Din)].
    wn_t = wn.T
    wr_t = wr.T
    wa_t = wa.T                                   # [Din+Drel+Din, Dout]
    wa1, wa2, wa3 = wa_t[:din], wa_t[din:din + drel], wa_t[din + drel:]
    bn2, br2, ba2 = bn[None, :], br[None, :], ba[None, :]
    att_n_row = att_n.reshape(1, n)               # lane-major att_n for deg_a

    num_blocks = n // tile_dst
    grid = (num_blocks,)

    def full(shape):
        nd = len(shape)
        return pl.BlockSpec(shape, lambda i, _nd=nd: (0,) * _nd)

    in_specs = [
        full(h.shape),                                        # h, all nodes
        full(att_n.shape),                                    # att_n, all nodes
        full(att_n_row.shape),                                # att_n, lane-major
        pl.BlockSpec((tile_dst, n), lambda i: (i, 0)),        # adj[dst block, :]
        pl.BlockSpec((tile_dst, n), lambda i: (i, 0)),        # att_e[dst block, :]
        pl.BlockSpec((tile_dst, n, drel), lambda i: (i, 0, 0)),  # rel[dst block]
        full(wn_t.shape), full(bn2.shape),
        full(wr_t.shape), full(br2.shape),
        full(wa1.shape), full(wa2.shape), full(wa3.shape), full(ba2.shape),
    ]

    kernel = functools.partial(img_gcn_kernel, tile_dst=tile_dst)
    semantics = ("parallel",) if num_blocks > 1 else ("arbitrary",)
    return pl.pallas_call(
        kernel,
        out_shape=jax.ShapeDtypeStruct((n, dout), jnp.float32),
        grid=grid,
        in_specs=in_specs,
        out_specs=pl.BlockSpec((tile_dst, dout), lambda i: (i, 0)),
        compiler_params=pltpu.CompilerParams(dimension_semantics=semantics),
    )(h, att_n, att_n_row, adj, att_e, rel_dense,
      wn_t, bn2, wr_t, br2, wa1, wa2, wa3, ba2)


def reference(h, att_n, adj, att_e, rel_dense, params):
    wn, bn, wr, br, wa, ba = (params["wn"], params["bn"], params["wr"],
                              params["br"], params["wa"], params["ba"])
    h_new = h @ wn.T + bn
    z1 = adj @ (att_n * h_new)
    rel_t = rel_dense @ wr.T + br                        # [N, N, Drel]
    z2 = jnp.sum((adj * att_e)[:, :, None] * rel_t, axis=1)
    cat = jnp.concatenate([z1, z2, h_new], axis=1)
    return att_n * jnp.maximum(cat @ wa.T + ba, 0.0)


if __name__ == "__main__":
    N, IN_DIMS, REL_DIMS, OUT_DIMS = 16, 32, 16, 32

    key = jax.random.PRNGKey(0)
    keys = jax.random.split(key, 12)

    # Deterministic "Linear" parameters (shapes from the module's __init__).
    params = {
        "wn": jax.random.normal(keys[0], (IN_DIMS, IN_DIMS), jnp.float32) / jnp.sqrt(IN_DIMS),
        "bn": jax.random.normal(keys[1], (IN_DIMS,), jnp.float32) * 0.1,
        "wr": jax.random.normal(keys[2], (REL_DIMS, REL_DIMS), jnp.float32) / jnp.sqrt(REL_DIMS),
        "br": jax.random.normal(keys[3], (REL_DIMS,), jnp.float32) * 0.1,
        "wa": jax.random.normal(keys[4], (OUT_DIMS, IN_DIMS + REL_DIMS + IN_DIMS),
                                jnp.float32) / jnp.sqrt(IN_DIMS + REL_DIMS + IN_DIMS),
        "ba": jax.random.normal(keys[5], (OUT_DIMS,), jnp.float32) * 0.1,
    }

    # Synthetic graph data (dense form): ring (guarantees in-degree >= 1) plus
    # random extra edges; per-node / per-edge attention scalars; edge rel feats.
    ring = jnp.zeros((N, N), jnp.float32).at[jnp.arange(N), (jnp.arange(N) - 1) % N].set(1.0)
    rand_edges = (jax.random.uniform(keys[6], (N, N)) < 0.3).astype(jnp.float32)
    adj = jnp.clip(ring + rand_edges, 0.0, 1.0)

    h = jax.random.normal(keys[7], (N, IN_DIMS), jnp.float32)
    att_n = jax.random.uniform(keys[8], (N, 1), jnp.float32)
    att_e = jax.random.uniform(keys[9], (N, N), jnp.float32)
    rel_dense = jax.random.normal(keys[10], (N, N, REL_DIMS), jnp.float32)

    out = image_gcn_layer(h, att_n, adj, att_e, rel_dense, params)
    out = jax.block_until_ready(out)

    ref = reference(h, att_n, adj, att_e, rel_dense, params)
    assert out.shape == (N, OUT_DIMS)
    assert jnp.allclose(out, ref, rtol=1e-4, atol=1e-4), "mismatch vs JAX reference"

    print("KERNEL_OK")
</pallas_src>

<mosaic_0001>
module attributes {stable_mosaic.version = 11 : i64} {
  func.func @img_gcn_kernel(%arg0: i32, %arg1: memref<16x32xf32, #tpu.memory_space<vmem>>, %arg2: memref<16x1xf32, #tpu.memory_space<vmem>>, %arg3: memref<1x16xf32, #tpu.memory_space<vmem>>, %arg4: memref<16x16xf32, #tpu.memory_space<vmem>>, %arg5: memref<16x16xf32, #tpu.memory_space<vmem>>, %arg6: memref<16x16x16xf32, #tpu.memory_space<vmem>>, %arg7: memref<32x32xf32, #tpu.memory_space<vmem>>, %arg8: memref<1x32xf32, #tpu.memory_space<vmem>>, %arg9: memref<16x16xf32, #tpu.memory_space<vmem>>, %arg10: memref<1x16xf32, #tpu.memory_space<vmem>>, %arg11: memref<32x32xf32, #tpu.memory_space<vmem>>, %arg12: memref<16x32xf32, #tpu.memory_space<vmem>>, %arg13: memref<32x32xf32, #tpu.memory_space<vmem>>, %arg14: memref<1x32xf32, #tpu.memory_space<vmem>>, %arg15: memref<16x32xf32, #tpu.memory_space<vmem>>) attributes {dimension_semantics = [#tpu.dimension_semantics<arbitrary>], iteration_bounds = array<i64: 1>, scalar_prefetch = 0 : i64, scratch_operands = 0 : i64, tpu.core_type = #tpu.core_type<tc>, window_params = [{pipeline_mode = #tpu.pipeline_mode<synchronous>, transform_indices = @transform_0, window_bounds = array<i64: 16, 32>}, {pipeline_mode = #tpu.pipeline_mode<synchronous>, transform_indices = @transform_1, window_bounds = array<i64: 16, 1>}, {pipeline_mode = #tpu.pipeline_mode<synchronous>, transform_indices = @transform_2, window_bounds = array<i64: 1, 16>}, {transform_indices = @transform_3, window_bounds = array<i64: 16, 16>}, {transform_indices = @transform_4, window_bounds = array<i64: 16, 16>}, {transform_indices = @transform_5, window_bounds = array<i64: 16, 16, 16>}, {pipeline_mode = #tpu.pipeline_mode<synchronous>, transform_indices = @transform_6, window_bounds = array<i64: 32, 32>}, {pipeline_mode = #tpu.pipeline_mode<synchronous>, transform_indices = @transform_7, window_bounds = array<i64: 1, 32>}, {pipeline_mode = #tpu.pipeline_mode<synchronous>, transform_indices = @transform_8, window_bounds = array<i64: 16, 16>}, {pipeline_mode = #tpu.pipeline_mode<synchronous>, transform_indices = @transform_9, window_bounds = array<i64: 1, 16>}, {pipeline_mode = #tpu.pipeline_mode<synchronous>, transform_indices = @transform_10, window_bounds = array<i64: 32, 32>}, {pipeline_mode = #tpu.pipeline_mode<synchronous>, transform_indices = @transform_11, window_bounds = array<i64: 16, 32>}, {pipeline_mode = #tpu.pipeline_mode<synchronous>, transform_indices = @transform_12, window_bounds = array<i64: 32, 32>}, {pipeline_mode = #tpu.pipeline_mode<synchronous>, transform_indices = @transform_13, window_bounds = array<i64: 1, 32>}, {transform_indices = @transform_14, window_bounds = array<i64: 16, 32>}]} {
    %c16_i32 = arith.constant 16 : i32
    %0 = arith.muli %arg0, %c16_i32 : i32
    %1 = tpu.assume_multiple %0, 16 : i32
    %c0 = arith.constant 0 : index
    %c0_0 = arith.constant 0 : index
    %2 = vector.load %arg1[%c0, %c0_0] : memref<16x32xf32, #tpu.memory_space<vmem>>, vector<16x32xf32>
    %c0_1 = arith.constant 0 : index
    %c0_2 = arith.constant 0 : index
    %3 = vector.load %arg2[%c0_1, %c0_2] : memref<16x1xf32, #tpu.memory_space<vmem>>, vector<16x1xf32>
    %c0_3 = arith.constant 0 : index
    %c0_4 = arith.constant 0 : index
    %4 = vector.load %arg3[%c0_3, %c0_4] : memref<1x16xf32, #tpu.memory_space<vmem>>, vector<1x16xf32>
    %c0_5 = arith.constant 0 : index
    %c0_6 = arith.constant 0 : index
    %5 = vector.load %arg4[%c0_5, %c0_6] : memref<16x16xf32, #tpu.memory_space<vmem>>, vector<16x16xf32>
    %c0_7 = arith.constant 0 : index
    %c0_8 = arith.constant 0 : index
    %6 = vector.load %arg5[%c0_7, %c0_8] : memref<16x16xf32, #tpu.memory_space<vmem>>, vector<16x16xf32>
    %7 = arith.mulf %5, %6 : vector<16x16xf32>
    %8 = vector.broadcast %3 : vector<16x1xf32> to vector<16x32xf32>
    %9 = arith.mulf %8, %2 : vector<16x32xf32>
    %cst = arith.constant dense<0.000000e+00> : vector<16x32xf32>
    %10 = tpu.matmul %5, %9, %cst {dimension_numbers = #tpu.dot_dimension_numbers<[1], [0], [0], [1], [0, 0, 1, 1], [], []>} : vector<16x16xf32>, vector<16x32xf32>, vector<16x32xf32> -> vector<16x32xf32>
    %11 = vector.broadcast %4 : vector<1x16xf32> to vector<16x16xf32>
    %12 = arith.mulf %5, %11 : vector<16x16xf32>
    %cst_9 = arith.constant dense<0.000000e+00> : vector<16xf32>
    %13 = vector.multi_reduction <add>, %12, %cst_9 [1] : vector<16x16xf32> to vector<16xf32>
    %14 = vector.shape_cast %13 : vector<16xf32> to vector<16x1xf32>
    %c0_10 = arith.constant 0 : index
    %c0_11 = arith.constant 0 : index
    %15 = vector.load %arg7[%c0_10, %c0_11] : memref<32x32xf32, #tpu.memory_space<vmem>>, vector<32x32xf32>
    %cst_12 = arith.constant dense<0.000000e+00> : vector<16x32xf32>
    %16 = tpu.matmul %10, %15, %cst_12 {dimension_numbers = #tpu.dot_dimension_numbers<[1], [0], [0], [1], [0, 0, 1, 1], [], []>} : vector<16x32xf32>, vector<32x32xf32>, vector<16x32xf32> -> vector<16x32xf32>
    %c0_13 = arith.constant 0 : index
    %c0_14 = arith.constant 0 : index
    %17 = vector.load %arg8[%c0_13, %c0_14] : memref<1x32xf32, #tpu.memory_space<vmem>>, vector<1x32xf32>
    %18 = vector.broadcast %14 : vector<16x1xf32> to vector<16x32xf32>
    %19 = vector.broadcast %17 : vector<1x32xf32> to vector<16x32xf32>
    %20 = arith.mulf %18, %19 : vector<16x32xf32>
    %21 = arith.addf %16, %20 : vector<16x32xf32>
    %c0_15 = arith.constant 0 : index
    %c0_16 = arith.constant 0 : index
    %c0_17 = arith.constant 0 : index
    %22 = vector.load %arg6[%c0_15, %c0_16, %c0_17] : memref<16x16x16xf32, #tpu.memory_space<vmem>>, vector<16x16x16xf32>
    %23 = vector.shape_cast %7 : vector<16x16xf32> to vector<16x16x1xf32>
    %24 = vector.broadcast %23 : vector<16x16x1xf32> to vector<16x16x16xf32>
    %25 = arith.mulf %22, %24 : vector<16x16x16xf32>
    %cst_18 = arith.constant dense<0.000000e+00> : vector<16x16xf32>
    %26 = vector.multi_reduction <add>, %25, %cst_18 [1] : vector<16x16x16xf32> to vector<16x16xf32>
    %cst_19 = arith.constant dense<0.000000e+00> : vector<16xf32>
    %27 = vector.multi_reduction <add>, %7, %cst_19 [1] : vector<16x16xf32> to vector<16xf32>
    %28 = vector.shape_cast %27 : vector<16xf32> to vector<16x1xf32>
    %c0_20 = arith.constant 0 : index
    %c0_21 = arith.constant 0 : index
    %29 = vector.load %arg9[%c0_20, %c0_21] : memref<16x16xf32, #tpu.memory_space<vmem>>, vector<16x16xf32>
    %cst_22 = arith.constant dense<0.000000e+00> : vector<16x16xf32>
    %30 = tpu.matmul %26, %29, %cst_22 {dimension_numbers = #tpu.dot_dimension_numbers<[1], [0], [0], [1], [0, 0, 1, 1], [], []>} : vector<16x16xf32>, vector<16x16xf32>, vector<16x16xf32> -> vector<16x16xf32>
    %c0_23 = arith.constant 0 : index
    %c0_24 = arith.constant 0 : index
    %31 = vector.load %arg10[%c0_23, %c0_24] : memref<1x16xf32, #tpu.memory_space<vmem>>, vector<1x16xf32>
    %32 = vector.broadcast %28 : vector<16x1xf32> to vector<16x16xf32>
    %33 = vector.broadcast %31 : vector<1x16xf32> to vector<16x16xf32>
    %34 = arith.mulf %32, %33 : vector<16x16xf32>
    %35 = arith.addf %30, %34 : vector<16x16xf32>
    %36 = arith.index_cast %1 : i32 to index
    %c0_25 = arith.constant 0 : index
    %37 = vector.load %arg1[%36, %c0_25] : memref<16x32xf32, #tpu.memory_space<vmem>>, vector<16x32xf32>
    %38 = arith.index_cast %1 : i32 to index
    %c0_26 = arith.constant 0 : index
    %39 = vector.load %arg2[%38, %c0_26] : memref<16x1xf32, #tpu.memory_space<vmem>>, vector<16x1xf32>
    %c0_27 = arith.constant 0 : index
    %c0_28 = arith.constant 0 : index
    %40 = vector.load %arg7[%c0_27, %c0_28] : memref<32x32xf32, #tpu.memory_space<vmem>>, vector<32x32xf32>
    %cst_29 = arith.constant dense<0.000000e+00> : vector<16x32xf32>
    %41 = tpu.matmul %37, %40, %cst_29 {dimension_numbers = #tpu.dot_dimension_numbers<[1], [0], [0], [1], [0, 0, 1, 1], [], []>} : vector<16x32xf32>, vector<32x32xf32>, vector<16x32xf32> -> vector<16x32xf32>
    %c0_30 = arith.constant 0 : index
    %c0_31 = arith.constant 0 : index
    %42 = vector.load %arg8[%c0_30, %c0_31] : memref<1x32xf32, #tpu.memory_space<vmem>>, vector<1x32xf32>
    %43 = vector.broadcast %42 : vector<1x32xf32> to vector<16x32xf32>
    %44 = arith.addf %41, %43 : vector<16x32xf32>
    %c0_32 = arith.constant 0 : index
    %c0_33 = arith.constant 0 : index
    %45 = vector.load %arg11[%c0_32, %c0_33] : memref<32x32xf32, #tpu.memory_space<vmem>>, vector<32x32xf32>
    %cst_34 = arith.constant dense<0.000000e+00> : vector<16x32xf32>
    %46 = tpu.matmul %21, %45, %cst_34 {dimension_numbers = #tpu.dot_dimension_numbers<[1], [0], [0], [1], [0, 0, 1, 1], [], []>} : vector<16x32xf32>, vector<32x32xf32>, vector<16x32xf32> -> vector<16x32xf32>
    %c0_35 = arith.constant 0 : index
    %c0_36 = arith.constant 0 : index
    %47 = vector.load %arg12[%c0_35, %c0_36] : memref<16x32xf32, #tpu.memory_space<vmem>>, vector<16x32xf32>
    %cst_37 = arith.constant dense<0.000000e+00> : vector<16x32xf32>
    %48 = tpu.matmul %35, %47, %cst_37 {dimension_numbers = #tpu.dot_dimension_numbers<[1], [0], [0], [1], [0, 0, 1, 1], [], []>} : vector<16x16xf32>, vector<16x32xf32>, vector<16x32xf32> -> vector<16x32xf32>
    %49 = arith.addf %46, %48 : vector<16x32xf32>
    %c0_38 = arith.constant 0 : index
    %c0_39 = arith.constant 0 : index
    %50 = vector.load %arg13[%c0_38, %c0_39] : memref<32x32xf32, #tpu.memory_space<vmem>>, vector<32x32xf32>
    %cst_40 = arith.constant dense<0.000000e+00> : vector<16x32xf32>
    %51 = tpu.matmul %44, %50, %cst_40 {dimension_numbers = #tpu.dot_dimension_numbers<[1], [0], [0], [1], [0, 0, 1, 1], [], []>} : vector<16x32xf32>, vector<32x32xf32>, vector<16x32xf32> -> vector<16x32xf32>
    %52 = arith.addf %49, %51 : vector<16x32xf32>
    %c0_41 = arith.constant 0 : index
    %c0_42 = arith.constant 0 : index
    %53 = vector.load %arg14[%c0_41, %c0_42] : memref<1x32xf32, #tpu.memory_space<vmem>>, vector<1x32xf32>
    %54 = vector.broadcast %53 : vector<1x32xf32> to vector<16x32xf32>
    %55 = arith.addf %52, %54 : vector<16x32xf32>
    %cst_43 = arith.constant 0.000000e+00 : f32
    %56 = vector.broadcast %cst_43 : f32 to vector<16x32xf32>
    %57 = arith.maximumf %55, %56 : vector<16x32xf32>
    %58 = vector.broadcast %39 : vector<16x1xf32> to vector<16x32xf32>
    %59 = arith.mulf %58, %57 : vector<16x32xf32>
    %c0_44 = arith.constant 0 : index
    %c0_45 = arith.constant 0 : index
    %60 = vector.load %arg15[%c0_44, %c0_45] : memref<16x32xf32, #tpu.memory_space<vmem>>, vector<16x32xf32>
    tpu.vector_store %arg15[%c0_44, %c0_45], %59 {strides = array<i32>} : memref<16x32xf32, #tpu.memory_space<vmem>>, vector<16x32xf32>,
    return
  }
  func.func @transform_0(%arg0: i32) -> (i32, i32) {
    %c0_i32 = arith.constant 0 : i32
    %c0_i32_0 = arith.constant 0 : i32
    %c0_i32_1 = arith.constant 0 : i32
    return %c0_i32, %c0_i32_0 : i32, i32
  }
  func.func @transform_1(%arg0: i32) -> (i32, i32) {
    %c0_i32 = arith.constant 0 : i32
    %c0_i32_0 = arith.constant 0 : i32
    %c0_i32_1 = arith.constant 0 : i32
    return %c0_i32, %c0_i32_0 : i32, i32
  }
  func.func @transform_2(%arg0: i32) -> (i32, i32) {
    %c0_i32 = arith.constant 0 : i32
    %c0_i32_0 = arith.constant 0 : i32
    %c0_i32_1 = arith.constant 0 : i32
    return %c0_i32, %c0_i32_0 : i32, i32
  }
  func.func @transform_3(%arg0: i32) -> (i32, i32) {
    %c0_i32 = arith.constant 0 : i32
    %c0_i32_0 = arith.constant 0 : i32
    return %arg0, %c0_i32 : i32, i32
  }
  func.func @transform_4(%arg0: i32) -> (i32, i32) {
    %c0_i32 = arith.constant 0 : i32
    %c0_i32_0 = arith.constant 0 : i32
    return %arg0, %c0_i32 : i32, i32
  }
  func.func @transform_5(%arg0: i32) -> (i32, i32, i32) {
    %c0_i32 = arith.constant 0 : i32
    %c0_i32_0 = arith.constant 0 : i32
    %c0_i32_1 = arith.constant 0 : i32
    return %arg0, %c0_i32, %c0_i32_0 : i32, i32, i32
  }
  func.func @transform_6(%arg0: i32) -> (i32, i32) {
    %c0_i32 = arith.constant 0 : i32
    %c0_i32_0 = arith.constant 0 : i32
    %c0_i32_1 = arith.constant 0 : i32
    return %c0_i32, %c0_i32_0 : i32, i32
  }
  func.func @transform_7(%arg0: i32) -> (i32, i32) {
    %c0_i32 = arith.constant 0 : i32
    %c0_i32_0 = arith.constant 0 : i32
    %c0_i32_1 = arith.constant 0 : i32
    return %c0_i32, %c0_i32_0 : i32, i32
  }
  func.func @transform_8(%arg0: i32) -> (i32, i32) {
    %c0_i32 = arith.constant 0 : i32
    %c0_i32_0 = arith.constant 0 : i32
    %c0_i32_1 = arith.constant 0 : i32
    return %c0_i32, %c0_i32_0 : i32, i32
  }
  func.func @transform_9(%arg0: i32) -> (i32, i32) {
    %c0_i32 = arith.constant 0 : i32
    %c0_i32_0 = arith.constant 0 : i32
    %c0_i32_1 = arith.constant 0 : i32
    return %c0_i32, %c0_i32_0 : i32, i32
  }
  func.func @transform_10(%arg0: i32) -> (i32, i32) {
    %c0_i32 = arith.constant 0 : i32
    %c0_i32_0 = arith.constant 0 : i32
    %c0_i32_1 = arith.constant 0 : i32
    return %c0_i32, %c0_i32_0 : i32, i32
  }
  func.func @transform_11(%arg0: i32) -> (i32, i32) {
    %c0_i32 = arith.constant 0 : i32
    %c0_i32_0 = arith.constant 0 : i32
    %c0_i32_1 = arith.constant 0 : i32
    return %c0_i32, %c0_i32_0 : i32, i32
  }
  func.func @transform_12(%arg0: i32) -> (i32, i32) {
    %c0_i32 = arith.constant 0 : i32
    %c0_i32_0 = arith.constant 0 : i32
    %c0_i32_1 = arith.constant 0 : i32
    return %c0_i32, %c0_i32_0 : i32, i32
  }
  func.func @transform_13(%arg0: i32) -> (i32, i32) {
    %c0_i32 = arith.constant 0 : i32
    %c0_i32_0 = arith.constant 0 : i32
    %c0_i32_1 = arith.constant 0 : i32
    return %c0_i32, %c0_i32_0 : i32, i32
  }
  func.func @transform_14(%arg0: i32) -> (i32, i32) {
    %c0_i32 = arith.constant 0 : i32
    %c0_i32_0 = arith.constant 0 : i32
    return %arg0, %c0_i32 : i32, i32
  }
}

</mosaic_0001>

<bundles_post_ra>
// kernel: tpu_custom_call.1
= control target key start
LH: loop header
LB: loop body
LE: loop exit
PB: predicated region body
PF: predicated region fallthrough
CT: control target
= control target key end

     0   :  { %19 = vsyncpa [#allocation3], 0  ;;  %s2060_s0 = inlined_call_operand.hbm [shape: f32[16,32], index: 0, kind: input, shape index: {}]   ;;  %s2061_s1 = inlined_call_operand.vmem [shape: f32[16,1], index: 1, kind: input, shape index: {}]   ;;  %s2062_s2 = inlined_call_operand.vmem [shape: f32[1,16], index: 2, kind: input, shape index: {}]   ;;  %s2063_s3 = inlined_call_operand.hbm [shape: f32[16,16], index: 3, kind: input, shape index: {}]   ;;  %s2064_s4 = inlined_call_operand.hbm [shape: f32[16,16], index: 4, kind: input, shape index: {}]   ;;  %s2065_s5 = inlined_call_operand.hbm [shape: f32[16,16,16], index: 5, kind: input, shape index: {}]   ;;  %s2066_s6 = inlined_call_operand.vmem [shape: f32[32,32], index: 6, kind: input, shape index: {}]   ;;  %s2067_s7 = inlined_call_operand.vmem [shape: f32[1,32], index: 7, kind: input, shape index: {}]   ;;  %s2068_s8 = inlined_call_operand.hbm [shape: f32[16,16], index: 8, kind: input, shape index: {}]   ;;  %s2069_s9 = inlined_call_operand.vmem [shape: f32[1,16], index: 9, kind: input, shape index: {}]   ;;  %s2070_s10 = inlined_call_operand.hbm [shape: f32[32,32], index: 10, kind: input, shape index: {}]   ;;  %s2071_s11 = inlined_call_operand.vmem [shape: f32[16,32], index: 11, kind: input, shape index: {}]   ;;  %s2072_s12 = inlined_call_operand.hbm [shape: f32[32,32], index: 12, kind: input, shape index: {}]   ;;  %s2073_s13 = inlined_call_operand.vmem [shape: f32[1,32], index: 13, kind: input, shape index: {}]   ;;  %s2074_s14 = inlined_call_operand.hbm [shape: f32[16,32], index: 14, kind: output, shape index: {}]  }
   0x1   :  { %20 = vsyncpa [#allocation6], 0 }
   0x2   :  { %21 = vsyncpa [#allocation9], 0 }
   0x3   :  { %22 = vsyncpa [#allocation12], 0 }
   0x4   :  { %23 = vsyncpa [#allocation4], 0  ;;  %s1628_s29 = smov [#allocation5]   ;;  %s1629_s15 = smov [#allocation8]  }
   0x5   :  { %s45_s30 = sshll.u32 %s1628_s29, 4  ;;  %s69_s16 = sshll.u32 %s1629_s15, 4  ;;  %s46_s30 = int_to_ptr.vmem [resolvable:$true] %s45_s30  ;;  %s1714_s16 = int_to_ptr.vmem [resolvable:$true] %s69_s16 }
   0x6   :  { %s1442_s19 = scalar_lea.hbm %s2063_s3, 256 }
   0x7   :  { %p1443_p0 = scmp.ne.s32.totalorder %s2063_s3, %s1442_s19  ;;  %p1446_p1 = scmp.lt.u32.totalorder %s1442_s19, %s2063_s3 }
   0x9   :  { %p1448_p2 = pnand %p1446_p1, %p1443_p0 }
   0xb   :  { %1451 = shalt.err (!%p1448_p2)
}
   0xc   :  { %s1452_s24 = scalar_lea.vmem %s46_s30, 256  ;;  %p1457_p4 = scmp.lt.s32.totalorder %s46_s30, %s46_s30 }
   0xd   :  { %p1453_p3 = scmp.ne.s32.totalorder %s46_s30, %s1452_s24  ;;  %p1458_p5 = scmp.lt.s32.totalorder %s1452_s24, %s1452_s24 }
   0xf   :  { %p1459_p6 = por %p1458_p5, %p1457_p4 }
  0x11   :  { %p1460_p7 = pnand %p1459_p6, %p1453_p3 }
  0x13   :  { %1463 = shalt.err (!%p1460_p7)
}
  0x14   :  { %s1630_s25 = smov 128   ;;  %s1631_s26 = smov 8  }
  0x15   :  { %51 = dma.hbm_to_vmem [thread:$0]  %s2063_s3, 256, %s46_s30, [#allocation6], %s1630_s25, %s1630_s25, %s1631_s26  }
  0x16   :  { %s1464_s17 = scalar_lea.hbm %s2065_s5, 4096 }
  0x17   :  { %p1465_p8 = scmp.ne.s32.totalorder %s2065_s5, %s1464_s17  ;;  %p1468_p9 = scmp.lt.u32.totalorder %s1464_s17, %s2065_s5 }
  0x19   :  { %p1470_p10 = pnand %p1468_p9, %p1465_p8 }
  0x1b   :  { %1473 = shalt.err (!%p1470_p10)
}
  0x1c   :  { %s1474_s22 = scalar_lea.vmem %s1714_s16, 4096  ;;  %p1479_p12 = scmp.lt.s32.totalorder %s1714_s16, %s1714_s16 }
  0x1d   :  { %p1475_p11 = scmp.ne.s32.totalorder %s1714_s16, %s1474_s22  ;;  %p1480_p13 = scmp.lt.s32.totalorder %s1474_s22, %s1474_s22 }
  0x1f   :  { %p1481_p0 = por %p1480_p13, %p1479_p12 }
  0x21   :  { %p1482_p1 = pnand %p1481_p0, %p1475_p11 }
  0x23   :  { %1485 = shalt.err (!%p1482_p1)
}
  0x24   :  { %75 = dma.hbm_to_vmem [thread:$0]  %s2065_s5, 4096, %s1714_s16, [#allocation9], %s1630_s25, %s1630_s25, %s1631_s26  }
  0x25   :  { %s1632_s23 = smov [#allocation11]   ;;  %s1633_s27 = smov [#allocation2]  }
  0x26   :  { %s99_s24 = sshll.u32 %s1632_s23, 4  ;;  %s29_s28 = sshll.u32 %s1633_s27, 4  ;;  %s100_s24 = int_to_ptr.vmem [resolvable:$true] %s99_s24  ;;  %s1751_s28 = int_to_ptr.vmem [resolvable:$true] %s29_s28 }
  0x27   :  { %s1486_s17 = scalar_lea.hbm %s2070_s10, 512 }
  0x28   :  { %p1487_p2 = scmp.ne.s32.totalorder %s2070_s10, %s1486_s17  ;;  %p1490_p3 = scmp.lt.u32.totalorder %s1486_s17, %s2070_s10 }
  0x2a   :  { %p1492_p4 = pnand %p1490_p3, %p1487_p2 }
  0x2c   :  { %1495 = shalt.err (!%p1492_p4)
}
  0x2d   :  { %s1496_s5 = scalar_lea.vmem %s100_s24, 512  ;;  %p1501_p6 = scmp.lt.s32.totalorder %s100_s24, %s100_s24 }
  0x2e   :  { %p1497_p5 = scmp.ne.s32.totalorder %s100_s24, %s1496_s5  ;;  %p1502_p7 = scmp.lt.s32.totalorder %s1496_s5, %s1496_s5 }
  0x30   :  { %p1503_p8 = por %p1502_p7, %p1501_p6 }
  0x32   :  { %p1504_p9 = pnand %p1503_p8, %p1497_p5 }
  0x34   :  { %1507 = shalt.err (!%p1504_p9)
}
  0x35   :  { %105 = dma.hbm_to_vmem [thread:$0]  %s2070_s10, 512, %s100_s24, [#allocation12], %s1630_s25, %s1630_s25, %s1631_s26  }
  0x36   :  { %s1508_s23 = scalar_lea.hbm %s2060_s0, 256 }
  0x37   :  { %p1509_p10 = scmp.ne.s32.totalorder %s2060_s0, %s1508_s23  ;;  %p1512_p11 = scmp.lt.u32.totalorder %s1508_s23, %s2060_s0 }
  0x39   :  { %p1514_p12 = pnand %p1512_p11, %p1509_p10 }
  0x3b   :  { %1517 = shalt.err (!%p1514_p12)
}
  0x3c   :  { %s1518_s18 = scalar_lea.vmem %s1751_s28, 256  ;;  %p1523_p0 = scmp.lt.s32.totalorder %s1751_s28, %s1751_s28 }
  0x3d   :  { %p1519_p13 = scmp.ne.s32.totalorder %s1751_s28, %s1518_s18  ;;  %p1524_p1 = scmp.lt.s32.totalorder %s1518_s18, %s1518_s18 }
  0x3f   :  { %p1525_p2 = por %p1524_p1, %p1523_p0 }
  0x41   :  { %p1526_p3 = pnand %p1525_p2, %p1519_p13 }
  0x43   :  { %1529 = shalt.err (!%p1526_p3)
}
  0x44   :  { %35 = dma.hbm_to_vmem [thread:$0]  %s2060_s0, 256, %s1751_s28, [#allocation3], %s1630_s25, %s1630_s25, %s1631_s26  }
  0x45   :  { %s1634_s19 = smov [#allocation7]   ;;  %s1635_s21 = smov [#allocation10]  }
  0x46   :  { %s57_s20 = sshll.u32 %s1634_s19, 4  ;;  %s85_s5 = sshll.u32 %s1635_s21, 4  ;;  %s58_s20 = int_to_ptr.vmem [resolvable:$true] %s57_s20  ;;  %s1788_s5 = int_to_ptr.vmem [resolvable:$true] %s85_s5 }
  0x47   :  { %s1530_s3 = scalar_lea.hbm %s2064_s4, 256 }
  0x48   :  { %p1531_p4 = scmp.ne.s32.totalorder %s2064_s4, %s1530_s3  ;;  %p1534_p5 = scmp.lt.u32.totalorder %s1530_s3, %s2064_s4 }
  0x4a   :  { %p1536_p6 = pnand %p1534_p5, %p1531_p4 }
  0x4c   :  { %1539 = shalt.err (!%p1536_p6)
}
  0x4d   :  { %s1540_s0 = scalar_lea.vmem %s58_s20, 256  ;;  %p1545_p8 = scmp.lt.s32.totalorder %s58_s20, %s58_s20 }
  0x4e   :  { %p1541_p7 = scmp.ne.s32.totalorder %s58_s20, %s1540_s0  ;;  %p1546_p9 = scmp.lt.s32.totalorder %s1540_s0, %s1540_s0 }
  0x50   :  { %p1547_p10 = por %p1546_p9, %p1545_p8 }
  0x52   :  { %p1548_p11 = pnand %p1547_p10, %p1541_p7 }
  0x54   :  { %1551 = shalt.err (!%p1548_p11)
}
  0x55   :  { %63 = dma.hbm_to_vmem [thread:$0]  %s2064_s4, 256, %s58_s20, [#allocation6], %s1630_s25, %s1630_s25, %s1631_s26  }
  0x56   :  { %s1552_s10 = scalar_lea.hbm %s2068_s8, 256 }
  0x57   :  { %p1553_p12 = scmp.ne.s32.totalorder %s2068_s8, %s1552_s10  ;;  %p1556_p13 = scmp.lt.u32.totalorder %s1552_s10, %s2068_s8 }
  0x59   :  { %p1558_p0 = pnand %p1556_p13, %p1553_p12 }
  0x5b   :  { %1561 = shalt.err (!%p1558_p0)
}
  0x5c   :  { %s1562_s22 = scalar_lea.vmem %s1788_s5, 256  ;;  %p1567_p2 = scmp.lt.s32.totalorder %s1788_s5, %s1788_s5 }
  0x5d   :  { %p1563_p1 = scmp.ne.s32.totalorder %s1788_s5, %s1562_s22  ;;  %p1568_p3 = scmp.lt.s32.totalorder %s1562_s22, %s1562_s22 }
  0x5f   :  { %p1569_p4 = por %p1568_p3, %p1567_p2 }
  0x61   :  { %p1570_p5 = pnand %p1569_p4, %p1563_p1 }
  0x63   :  { %1573 = shalt.err (!%p1570_p5)
}
  0x64   :  { %91 = dma.hbm_to_vmem [thread:$0]  %s2068_s8, 256, %s1788_s5, [#allocation9], %s1630_s25, %s1630_s25, %s1631_s26  }
  0x65   :  { %s1636_s3 = smov [#allocation13]   ;;  %s1574_s29 = scalar_lea.hbm %s2072_s12, 512 }
  0x66   :  { %s113_s30 = sshll.u32 %s1636_s3, 4  ;;  %p1575_p6 = scmp.ne.s32.totalorder %s2072_s12, %s1574_s29  ;;  %s114_s30 = int_to_ptr.vmem [resolvable:$true] %s113_s30 }
  0x67   :  { %p1578_p7 = scmp.lt.u32.totalorder %s1574_s29, %s2072_s12 }
  0x69   :  { %p1580_p8 = pnand %p1578_p7, %p1575_p6 }
  0x6b   :  { %1583 = shalt.err (!%p1580_p8)
}
  0x6c   :  { %s1584_s18 = scalar_lea.vmem %s114_s30, 512  ;;  %p1589_p10 = scmp.lt.s32.totalorder %s114_s30, %s114_s30 }
  0x6d   :  { %p1585_p9 = scmp.ne.s32.totalorder %s114_s30, %s1584_s18  ;;  %p1590_p11 = scmp.lt.s32.totalorder %s1584_s18, %s1584_s18 }
  0x6f   :  { %p1591_p12 = por %p1590_p11, %p1589_p10 }
  0x71   :  { %p1592_p13 = pnand %p1591_p12, %p1585_p9 }
  0x73   :  { %1595 = shalt.err (!%p1592_p13)
}
  0x74   :  { %119 = dma.hbm_to_vmem [thread:$0]  %s2072_s12, 512, %s114_s30, [#allocation12], %s1630_s25, %s1630_s25, %s1631_s26  }
  0x75   :  { %1618 = dma.done.wait [#allocation3], 256  }
  0x76   :  { %1619 = vsyncadd [#allocation3], 4294967040 }
  0x77   :  { %1620 = dma.done.wait [#allocation6], 512  }
  0x78   :  { %1621 = vsyncadd [#allocation6], 4294966784 }
  0x79   :  { %1622 = dma.done.wait [#allocation9], 4352  }
  0x7a   :  { %1623 = vsyncadd [#allocation9], 4294962944 }
  0x7b   :  { %1624 = dma.done.wait [#allocation12], 1024  }
  0x7c   :  { %1625 = vsyncadd [#allocation12], 4294966272  ;;  %v390_v0 = vlaneseq  ;;  %v1637_v1 = vmov 0   ;;  %v1845_v3 = vld [vmem:[%s2061_s1] sm:$0xff]  ;;  %v1847_v4 = vld [vmem:[#allocation5] sm:$0xff]  ;;  %vm167_vm0 = vcmask 130048  }
  0x7d   :  { %1440 = vset.pattern.permute.xlu0 %v1637_v1  ;;  %1441 = vset.pattern.permute.xlu1 %v1637_v1  ;;  %v151_v5 = vld [vmem:[#allocation7] sm:$0xff]  ;;  %v1856_v7 = vld [vmem:[%s2061_s1 + $0x8] sm:$0xff]  ;;  %v1861_v11 = vld [vmem:[#allocation5 + $0x8] sm:$0xff]  ;;  %vm775_vm1 = vcmask 1041409   ;;  %vm777_vm2 = vcmask 1042434   ;;  %vm779_vm3 = vcmask 1043459  }
  0x7e   :  { %v1840_v2 = vshrl.u32 %v390_v0, 7  ;;  %157 = vperm.xlu0 %1440, %v1845_v3   ;;  %1320 = vmatprep.mubr.msk.f32.mxu0 %vm167_vm0, %v1847_v4  ;;  %v153_v8 = vmul.f32 %v151_v5, %v1847_v4  ;;  %v152_v12 = vld [vmem:[#allocation7 + $0x8] sm:$0xff]  ;;  %v1264_v35 = vld [vmem:[%s2062_s2] ss:$0 sm:$0xff]  ;;  %v265_v51 = vld [vmem:[%s2066_s6 + $0x10] sm:$0xff]  ;;  %vm781_vm4 = vcmask 1044484  }
  0x7f   :  { %v1865_v16 = vmul.f32 %v152_v12, %v1861_v11  ;;  %v255_v37 = vmul.f32 %v1264_v35, %v1847_v4  ;;  %v256_v39 = vmul.f32 %v1264_v35, %v1861_v11  ;;  %v1889_v42 = vld [vmem:[#allocation2] sm:$0xff]  ;;  %v1891_v43 = vld [vmem:[#allocation2 + $0x8] sm:$0xff]  ;;  %v266_v52 = vld [vmem:[%s2066_s6 + $0x18] sm:$0xff]  ;;  %vm783_vm5 = vcmask 1045509  }
  0x80   :  { %v403_v6 = vsub.s32 1, %v1840_v2  ;;  %v414_v10 = vsub.s32 2, %v1840_v2  ;;  %v392_v13 = vsub.s32 0, %v1840_v2  ;;  %v425_v19 = vsub.s32 3, %v1840_v2  ;;  %v263_v45 = vld [vmem:[%s2066_s6] sm:$0xff]  ;;  %v264_v46 = vld [vmem:[%s2066_s6 + $0x8] sm:$0xff] }
  0x81   :  { %v436_v22 = vsub.s32 4, %v1840_v2  ;;  %v447_v25 = vsub.s32 5, %v1840_v2  ;;  %v458_v28 = vsub.s32 6, %v1840_v2  ;;  %v469_v31 = vsub.s32 7, %v1840_v2  ;;  %v748_v54 = vld [vmem:[#allocation10] sm:$0xff]  ;;  %v749_v55 = vld [vmem:[#allocation10 + $0x8] sm:$0xff] }
  0x82   :  { %162 = vperm.xlu0 %1440, %v1856_v7   ;;  %v404_v9 = vrot.slane %v153_v8, %v403_v6  ;;  %v393_v14 = vrot.slane %v153_v8, %v392_v13  ;;  %v415_v15 = vrot.slane %v153_v8, %v414_v10  ;;  %v481_v17 = vrot.slane %v1865_v16, %v392_v13  ;;  %v358_v13 = vld [vmem:[#allocation8] sm:$0xff] }
  0x83   :  { %v492_v18 = vrot.slane %v1865_v16, %v403_v6  ;;  %v426_v20 = vrot.slane %v153_v8, %v425_v19  ;;  %v503_v21 = vrot.slane %v1865_v16, %v414_v10  ;;  %v437_v23 = vrot.slane %v153_v8, %v436_v22 }
  0x84   :  { %395 = vbcast.lane.b32.xlu1 %v393_v14, 256  ;;  %v514_v24 = vrot.slane %v1865_v16, %v425_v19  ;;  %v448_v26 = vrot.slane %v153_v8, %v447_v25  ;;  %v525_v27 = vrot.slane %v1865_v16, %v436_v22  ;;  %v459_v29 = vrot.slane %v153_v8, %v458_v28  ;;  %v361_v19 = vld [vmem:[#allocation8 + $0x18] sm:$0xff] }
  0x85   :  { %v536_v30 = vrot.slane %v1865_v16, %v447_v25  ;;  %v470_v32 = vrot.slane %v153_v8, %v469_v31  ;;  %v547_v33 = vrot.slane %v1865_v16, %v458_v28  ;;  %v558_v34 = vrot.slane %v1865_v16, %v469_v31  ;;  %v374_v28 = vld [vmem:[#allocation8 + $0x80] sm:$0xff] }
  0x86   :  { %406 = vbcast.lane.b32.xlu0 %v404_v9, 256  ;;  %v742_v36 = vsel %vm167_vm0, %v153_v8, 0.0  ;;  %v257_v38 = vsel %vm167_vm0, %v255_v37, 0.0  ;;  %v260_v40 = vsel %vm167_vm0, %v256_v39, 0.0  ;;  %v1901_v50 = vpack.c.bf16 %v264_v46, %v263_v45 }
  0x87   :  { %v1910_v53 = vpack.c.bf16 %v266_v52, %v265_v51  ;;  %v1917_v56 = vpack.c.bf16 %v749_v55, %v748_v54  ;;  %v745_v61 = vsel %vm167_vm0, %v1865_v16, 0.0  ;;  %v365_v52 = vld [vmem:[#allocation8 + $0x38] sm:$0xff]  ;;  %v364_v54 = vld [vmem:[#allocation8 + $0x30] sm:$0xff]  ;;  %v378_v55 = vld [vmem:[#allocation8 + $0xa0] sm:$0xff]  ;;  %vm785_vm6 = vcmask 1046534  }
  0x88   :  { %399 = vbcast.lane.b32.xlu1 %v393_v14, 264  ;;  %v359_v14 = vld [vmem:[#allocation8 + $0x8] sm:$0xff]  ;;  %vm276_vm7 = vcmask 261120   ;;  %vm787_vm8 = vcmask 1047559  }
  0x8a   :  { %417 = vbcast.lane.b32.xlu0 %v415_v15, 256 }
  0x8c   :  { %410 = vbcast.lane.b32.xlu1 %v404_v9, 264 }
  0x8e   :  { %483 = vbcast.lane.b32.xlu0 %v481_v17, 256 }
  0x90   :  { %421 = vbcast.lane.b32.xlu1 %v415_v15, 264 }
  0x92   :  { %494 = vbcast.lane.b32.xlu0 %v492_v18, 256 }
  0x94   :  { %487 = vbcast.lane.b32.xlu1 %v481_v17, 264 }
  0x96   :  { %428 = vbcast.lane.b32.xlu0 %v426_v20, 256 }
  0x98   :  { %498 = vbcast.lane.b32.xlu1 %v492_v18, 264  ;;  %v360_v18 = vld [vmem:[#allocation8 + $0x10] sm:$0xff] }
  0x9a   :  { %505 = vbcast.lane.b32.xlu0 %v503_v21, 256 }
  0x9c   :  { %432 = vbcast.lane.b32.xlu1 %v426_v20, 264 }
  0x9e   :  { %439 = vbcast.lane.b32.xlu0 %v437_v23, 256 }
  0xa0   :  { %509 = vbcast.lane.b32.xlu1 %v503_v21, 264 }
  0xa2   :  { %516 = vbcast.lane.b32.xlu0 %v514_v24, 256 }
  0xa4   :  { %443 = vbcast.lane.b32.xlu1 %v437_v23, 264 }
  0xa6   :  { %450 = vbcast.lane.b32.xlu0 %v448_v26, 256 }
  0xa8   :  { %520 = vbcast.lane.b32.xlu1 %v514_v24, 264 }
  0xaa   :  { %527 = vbcast.lane.b32.xlu0 %v525_v27, 256 }
  0xac   :  { %454 = vbcast.lane.b32.xlu1 %v448_v26, 264  ;;  %v362_v26 = vld [vmem:[#allocation8 + $0x20] sm:$0xff] }
  0xae   :  { %461 = vbcast.lane.b32.xlu0 %v459_v29, 256 }
  0xb0   :  { %531 = vbcast.lane.b32.xlu1 %v525_v27, 264  ;;  %v363_v27 = vld [vmem:[#allocation8 + $0x28] sm:$0xff] }
  0xb2   :  { %538 = vbcast.lane.b32.xlu0 %v536_v30, 256 }
  0xb4   :  { %465 = vbcast.lane.b32.xlu1 %v459_v29, 264  ;;  %v375_v29 = vld [vmem:[#allocation8 + $0x88] sm:$0xff] }
  0xb6   :  { %472 = vbcast.lane.b32.xlu0 %v470_v32, 256 }
  0xb8   :  { %542 = vbcast.lane.b32.xlu1 %v536_v30, 264 }
  0xba   :  { %549 = vbcast.lane.b32.xlu0 %v547_v33, 256 }
  0xbc   :  { %476 = vbcast.lane.b32.xlu1 %v470_v32, 264 }
  0xbe   :  { %560 = vbcast.lane.b32.xlu0 %v558_v34, 256 }
  0xc0   :  { %553 = vbcast.lane.b32.xlu1 %v547_v33, 264 }
  0xc4   :  { %564 = vbcast.lane.b32.xlu1 %v558_v34, 264 }
  0xdd   :  { %743 = vadd.xlane.f32.xlu0 %v742_v36  ;;  %v376_v36 = vld [vmem:[#allocation8 + $0x90] sm:$0xff] }
  0xe1   :  { %258 = vadd.xlane.f32.xlu0 %v257_v38  ;;  %v377_v38 = vld [vmem:[#allocation8 + $0x98] sm:$0xff] }
  0xe5   :  { %261 = vadd.xlane.f32.xlu0 %v260_v40 }
  0xe8   :  { %746 = vadd.xlane.f32.xlu1 %v745_v61 }
  0xf6   :  { %v396_v57 = vpop.permute.xlu1 %395 }
  0xf7   :  { %v566_v17 = vmul.f32 %v396_v57, %v358_v13  ;;  %v379_v57 = vld [vmem:[#allocation8 + $0xa8] sm:$0xff] }
  0xf9   :  { %1230 = vperm.xlu1 %1441, %v1845_v3   ;;  %v598_v22 = vsel %vm167_vm0, %v566_v17, 0.0  ;;  %v367_v17 = vld [vmem:[#allocation8 + $0x48] sm:$0xff] }
  0xfa   :  { %v400_v58 = vpop.permute.xlu1 %399 }
  0xfb   :  { %1235 = vperm.xlu0 %1440, %v1856_v7   ;;  %v567_v3 = vmul.f32 %v400_v58, %v359_v14 }
  0xfd   :  { %v158_v41 = vpop.permute.xlu0 %157  ;;  %v599_v23 = vsel %vm167_vm0, %v567_v3, 0.0  ;;  %v366_v3 = vld [vmem:[#allocation8 + $0x40] sm:$0xff] }
  0xfe   :  { %v165_v47 = vmul.f32 %v158_v41, %v1889_v42  ;;  %v411_v60 = vpop.permute.xlu1 %410  ;;  %v600_v30 = vadd.f32 %v599_v23, %v598_v22 }
  0xff   :  { %v569_v24 = vmul.f32 %v411_v60, %v361_v19 }
 0x100   :  { %v601_v41 = vrot.slane %v600_v30, 4 }
 0x101   :  { %v163_v44 = vpop.permute.xlu0 %162  ;;  %v608_v33 = vsel %vm167_vm0, %v569_v24, 0.0 }
 0x102   :  { %v166_v48 = vmul.f32 %v163_v44, %v1891_v43  ;;  %v422_v63 = vpop.permute.xlu1 %421  ;;  %v602_v58 = vadd.f32 %v601_v41, %v600_v30  ;;  %v369_v30 = vld [vmem:[#allocation8 + $0x58] sm:$0xff] }
 0x103   :  { %v571_v34 = vmul.f32 %v422_v63, %v363_v27  ;;  %v381_v27 = vld [vmem:[#allocation8 + $0xb8] sm:$0xff] }
 0x104   :  { %v1381_v49 = vpack.c.bf16 %v166_v48, %v165_v47 }
 0x105   :  { %v407_v59 = vpop.permute.xlu0 %406  ;;  %v617_v47 = vsel %vm167_vm0, %v571_v34, 0.0  ;;  %v382_v34 = vld [vmem:[#allocation8 + $0xc0] sm:$0xff] }
 0x106   :  { %1382 = vmatprep.subr.bf16.mxu0 %v1381_v49  ;;  %v488_v1 = vpop.permute.xlu1 %487  ;;  %v568_v20 = vmul.f32 %v407_v59, %v360_v18  ;;  %v603_v18 = vrot.slane %v602_v58, 2 }
 0x107   :  { %1384 = vmatpush3.bf16.msra.mxu0 %v1381_v49  ;;  %v583_v37 = vmul.f32 %v488_v1, %v375_v29 }
 0x108   :  { %1386 = vmatprep.subr.bf16.mxu0 %v1901_v50  ;;  %v607_v31 = vsel %vm167_vm0, %v568_v20, 0.0  ;;  %v380_v20 = vld [vmem:[#allocation8 + $0xb0] sm:$0xff] }
 0x109   :  { %v418_v62 = vpop.permute.xlu0 %417  ;;  %v609_v44 = vadd.f32 %v608_v33, %v607_v31  ;;  %v671_v51 = vsel %vm167_vm0, %v583_v37, 0.0  ;;  %v368_v33 = vld [vmem:[#allocation8 + $0x50] sm:$0xff]  ;;  %v383_v37 = vld [vmem:[#allocation8 + $0xc8] sm:$0xff] }
 0x10a   :  { %1321 = vmatmul.mubr.msk.f32.vlgmr.msra.gmra.mrb[0].mxu0 %vm167_vm0, %v1861_v11  ;;  %v499_v4 = vpop.permute.xlu1 %498  ;;  %v570_v32 = vmul.f32 %v418_v62, %v362_v26 }
 0x10b   :  { %1388 = vmatpush3.bf16.msra.mxu0 %v1901_v50  ;;  %v585_v48 = vmul.f32 %v499_v4, %v377_v38  ;;  %v610_v59 = vrot.slane %v609_v44, 4  ;;  %v1963_v38 = vadd.f32 %v603_v18, %v602_v58  ;;  %v387_v18 = vld [vmem:[#allocation8 + $0xe8] sm:$0xff] }
 0x10c   :  { %1390 = vmatprep.subr.bf16.mxu0 %v1910_v53  ;;  %v616_v45 = vsel %vm167_vm0, %v570_v32, 0.0 }
 0x10d   :  { %v484_v0 = vpop.permute.xlu0 %483  ;;  %v618_v60 = vadd.f32 %v617_v47, %v616_v45  ;;  %v1953_v22 = vadd.f32 %v610_v59, %v609_v44 }
 0x10e   :  { %v433_v6 = vpop.permute.xlu1 %432  ;;  %v582_v35 = vmul.f32 %v484_v0, %v374_v28  ;;  %v680_v0 = vsel %vm167_vm0, %v585_v48, 0.0 }
 0x10f   :  { %1392 = vmatpush3.bf16.msra.mxu0 %v1910_v53  ;;  %v573_v1 = vmul.f32 %v433_v6, %v365_v52  ;;  %v619_v23 = vrot.slane %v618_v60, 4  ;;  %v384_v52 = vld [vmem:[#allocation8 + $0xd0] sm:$0xff] }
 0x110   :  { %1394 = vmatprep.subr.bf16.mxu0 %v1917_v56  ;;  %v670_v49 = vsel %vm167_vm0, %v582_v35, 0.0 }
 0x111   :  { %v495_v2 = vpop.permute.xlu0 %494  ;;  %v672_v63 = vadd.f32 %v671_v51, %v670_v49  ;;  %v626_v26 = vsel %vm167_vm0, %v573_v1, 0.0  ;;  %v1965_v41 = vadd.f32 %v619_v23, %v618_v60 }
 0x112   :  { %v510_v8 = vpop.permute.xlu1 %509  ;;  %v584_v46 = vmul.f32 %v495_v2, %v376_v36 }
 0x113   :  { %v587_v14 = vmul.f32 %v510_v8, %v379_v57  ;;  %v673_v24 = vrot.slane %v672_v63, 4 }
 0x114   :  { %v679_v61 = vsel %vm167_vm0, %v584_v46, 0.0  ;;  %v370_v46 = vld [vmem:[#allocation8 + $0x60] sm:$0xff] }
 0x115   :  { %v429_v5 = vpop.permute.xlu0 %428  ;;  %v681_v19 = vadd.f32 %v680_v0, %v679_v61  ;;  %v1968_v47 = vadd.f32 %v673_v24, %v672_v63  ;;  %v621_v63 = vrot.slane %v1965_v41, 2 }
 0x116   :  { %v1925_v10 = vpop.permute.xlu1 %443  ;;  %v572_v4 = vmul.f32 %v429_v5, %v364_v54  ;;  %v689_v5 = vsel %vm167_vm0, %v587_v14, 0.0 }
 0x117   :  { %v682_v35 = vrot.slane %v681_v19, 4  ;;  %v675_v23 = vrot.slane %v1968_v47, 2 }
 0x118   :  { %v625_v28 = vsel %vm167_vm0, %v572_v4, 0.0 }
 0x119   :  { %v506_v7 = vpop.permute.xlu0 %505  ;;  %v627_v44 = vadd.f32 %v626_v26, %v625_v28  ;;  %v683_v59 = vadd.f32 %v682_v35, %v681_v19 }
 0x11a   :  { %v1929_v12 = vpop.permute.xlu1 %520  ;;  %v586_v13 = vmul.f32 %v506_v7, %v378_v55  ;;  %v575_v7 = vmul.f32 %v1925_v10, %v367_v17  ;;  %v371_v10 = vld [vmem:[#allocation8 + $0x68] sm:$0xff]  ;;  %v385_v55 = vld [vmem:[#allocation8 + $0xd8] sm:$0xff] }
 0x11b   :  { %v589_v36 = vmul.f32 %v1929_v12, %v381_v27  ;;  %v684_v24 = vrot.slane %v683_v59, 2 }
 0x11c   :  { %v688_v6 = vsel %vm167_vm0, %v586_v13, 0.0  ;;  %v372_v13 = vld [vmem:[#allocation8 + $0x70] sm:$0xff] }
 0x11d   :  { %v1923_v9 = vpop.permute.xlu0 %439  ;;  %v690_v45 = vadd.f32 %v689_v5, %v688_v6  ;;  %v698_v60 = vsel %vm167_vm0, %v589_v36, 0.0  ;;  %v388_v5 = vld [vmem:[#allocation8 + $0xf0] sm:$0xff] }
 0x11e   :  { %v1933_v16 = vpop.permute.xlu1 %454  ;;  %v574_v8 = vmul.f32 %v1923_v9, %v366_v3  ;;  %v612_v9 = vrot.slane %v1953_v22, 2 }
 0x11f   :  { %v577_v48 = vmul.f32 %v1933_v16, %v369_v30  ;;  %v691_v1 = vrot.slane %v690_v45, 4 }
 0x120   :  { %v634_v49 = vsel %vm167_vm0, %v574_v8, 0.0 }
 0x121   :  { %v1927_v11 = vpop.permute.xlu0 %516  ;;  %v644_v17 = vsel %vm167_vm0, %v577_v48, 0.0 }
 0x122   :  { %v1939_v25 = vpop.permute.xlu1 %531  ;;  %v588_v32 = vmul.f32 %v1927_v11, %v380_v20  ;;  %v635_v11 = vsel %vm167_vm0, %v575_v7, 0.0  ;;  %v389_v7 = vld [vmem:[#allocation8 + $0xf8] sm:$0xff] }
 0x123   :  { %v591_v54 = vmul.f32 %v1939_v25, %v383_v37  ;;  %v386_v25 = vld [vmem:[#allocation8 + $0xe0] sm:$0xff]  ;;  %v636_v14 = vadd.f32 %v635_v11, %v634_v49  ;;  %v692_v37 = vadd.f32 %v691_v1, %v690_v45 }
 0x124   :  { %v697_v58 = vsel %vm167_vm0, %v588_v32, 0.0 }
 0x125   :  { %v1931_v15 = vpop.permute.xlu0 %450  ;;  %v699_v20 = vadd.f32 %v698_v60, %v697_v58  ;;  %v693_v58 = vrot.slane %v692_v37, 2 }
 0x126   :  { %v1945_v40 = vpop.permute.xlu1 %465  ;;  %v576_v12 = vmul.f32 %v1931_v15, %v368_v33  ;;  %v628_v15 = vrot.slane %v627_v44, 4 }
 0x127   :  { %v579_v61 = vmul.f32 %v1945_v40, %v371_v10  ;;  %v637_v10 = vrot.slane %v636_v14, 4 }
 0x128   :  { %v643_v19 = vsel %vm167_vm0, %v576_v12, 0.0  ;;  %v629_v36 = vadd.f32 %v628_v15, %v627_v44 }
 0x129   :  { %v1935_v21 = vpop.permute.xlu0 %527  ;;  %v653_v26 = vsel %vm167_vm0, %v579_v61, 0.0  ;;  %v645_v32 = vadd.f32 %v644_v17, %v643_v19  ;;  %v638_v60 = vadd.f32 %v637_v10, %v636_v14 }
 0x12a   :  { %v543_v2 = vpop.permute.xlu1 %542  ;;  %v590_v51 = vmul.f32 %v1935_v21, %v382_v34  ;;  %v373_v21 = vld [vmem:[#allocation8 + $0x78] sm:$0xff] }
 0x12b   :  { %v593_v3 = vmul.f32 %v543_v2, %v385_v55  ;;  %v622_v55 = vadd.f32 %v621_v63, %v1965_v41  ;;  %v646_v44 = vrot.slane %v645_v32, 4  ;;  %v605_v41 = vrot.slane %v1963_v38, 1 }
 0x12c   :  { %v706_v40 = vsel %vm167_vm0, %v590_v51, 0.0 }
 0x12d   :  { %v1943_v39 = vpop.permute.xlu0 %461  ;;  %v716_v34 = vsel %vm167_vm0, %v593_v3, 0.0  ;;  %v647_v63 = vadd.f32 %v646_v44, %v645_v32  ;;  %v623_v17 = vrot.slane %v622_v55, 1  ;;  %v639_v3 = vrot.slane %v638_v60, 2 }
 0x12e   :  { %v477_v31 = vpop.permute.xlu1 %476  ;;  %v578_v16 = vmul.f32 %v1943_v39, %v370_v46  ;;  %v707_v39 = vsel %vm167_vm0, %v591_v54, 0.0  ;;  %v700_v46 = vrot.slane %v699_v20, 4  ;;  %v613_v54 = vadd.f32 %v612_v9, %v1953_v22 }
 0x12f   :  { %v708_v33 = vadd.f32 %v707_v39, %v706_v40  ;;  %v694_v40 = vadd.f32 %v693_v58, %v692_v37 }
 0x130   :  { %v652_v27 = vsel %vm167_vm0, %v578_v16, 0.0  ;;  %v701_v61 = vadd.f32 %v700_v46, %v699_v20  ;;  %v614_v9 = vrot.slane %v613_v54, 1 }
 0x131   :  { %v539_v62 = vpop.permute.xlu0 %538  ;;  %v654_v11 = vadd.f32 %v653_v26, %v652_v27  ;;  %v709_v45 = vrot.slane %v708_v33, 4 }
 0x132   :  { %v554_v57 = vpop.permute.xlu1 %553  ;;  %v592_v4 = vmul.f32 %v539_v62, %v384_v52  ;;  %v581_v62 = vmul.f32 %v477_v31, %v373_v21  ;;  %v676_v21 = vadd.f32 %v675_v23, %v1968_v47  ;;  %v702_v14 = vrot.slane %v701_v61, 2 }
 0x133   :  { %v595_v2 = vmul.f32 %v554_v57, %v387_v18  ;;  %v630_v57 = vrot.slane %v629_v36, 2  ;;  %v615_v23 = vadd.f32 %v614_v9, %v613_v54 }
 0x134   :  { %v715_v30 = vsel %vm167_vm0, %v592_v4, 0.0  ;;  %v685_v4 = vadd.f32 %v684_v24, %v683_v59  ;;  %v677_v26 = vrot.slane %v676_v21, 1  ;;  %v606_v59 = vadd.f32 %v605_v41, %v1963_v38 }
 0x135   :  { %v473_v29 = vpop.permute.xlu0 %472  ;;  %v717_v51 = vadd.f32 %v716_v34, %v715_v30  ;;  %v725_v52 = vsel %vm167_vm0, %v595_v2, 0.0  ;;  %v631_v19 = vadd.f32 %v630_v57, %v629_v36  ;;  %v648_v24 = vrot.slane %v647_v63, 2 }
 0x136   :  { %v580_v28 = vmul.f32 %v473_v29, %v372_v13  ;;  %v565_v8 = vpop.permute.xlu1 %564  ;;  %v662_v29 = vsel %vm167_vm0, %v581_v62, 0.0  ;;  %v655_v13 = vrot.slane %v654_v11, 4  ;;  %v686_v62 = vrot.slane %v685_v4, 1 }
 0x137   :  { %v597_v48 = vmul.f32 %v565_v8, %v389_v7  ;;  %v718_v22 = vrot.slane %v717_v51, 4  ;;  %v703_v2 = vadd.f32 %v702_v14, %v701_v61  ;;  %v632_v8 = vrot.slane %v631_v19, 1 }
 0x138   :  { %v661_v49 = vsel %vm167_vm0, %v580_v28, 0.0  ;;  %v656_v27 = vadd.f32 %v655_v13, %v654_v11  ;;  %v695_v30 = vrot.slane %v694_v40, 1  ;;  %v678_v34 = vadd.f32 %v677_v26, %v676_v21 }
 0x139   :  { %v550_v0 = vpop.permute.xlu0 %549  ;;  %v734_v1 = vsel %vm167_vm0, %v597_v48, 0.0  ;;  %v719_v47 = vadd.f32 %v718_v22, %v717_v51  ;;  %v776_v10 = vsel %vm775_vm1, %v615_v23, %v606_v59  ;;  %v649_v46 = vadd.f32 %v648_v24, %v647_v63 }
 0x13a   :  { %v594_v6 = vmul.f32 %v550_v0, %v386_v25  ;;  %v663_v0 = vadd.f32 %v662_v29, %v661_v49  ;;  %v710_v25 = vadd.f32 %v709_v45, %v708_v33  ;;  %v657_v36 = vrot.slane %v656_v27, 2 }
 0x13b   :  { %v720_v37 = vrot.slane %v719_v47, 2  ;;  %v704_v11 = vrot.slane %v703_v2, 1  ;;  %v633_v48 = vadd.f32 %v632_v8, %v631_v19  ;;  %v696_v49 = vadd.f32 %v695_v30, %v694_v40  ;;  %v1265_v30 = vld [vmem:[%s2067_s7] ss:$0 sm:$0xff] }
 0x13c   :  { %v724_v12 = vsel %vm167_vm0, %v594_v6, 0.0  ;;  %v664_v20 = vrot.slane %v663_v0, 4  ;;  %v711_v28 = vrot.slane %v710_v25, 2  ;;  %v624_v6 = vadd.f32 %v623_v17, %v622_v55 }
 0x13d   :  { %v561_v35 = vpop.permute.xlu0 %560  ;;  %v726_v15 = vadd.f32 %v725_v52, %v724_v12  ;;  %v658_v55 = vadd.f32 %v657_v36, %v656_v27  ;;  %v721_v44 = vadd.f32 %v720_v37, %v719_v47  ;;  %v650_v45 = vrot.slane %v649_v46, 1 }
 0x13e   :  { %v596_v31 = vmul.f32 %v561_v35, %v388_v5  ;;  %v640_v5 = vadd.f32 %v639_v3, %v638_v60  ;;  %v665_v32 = vadd.f32 %v664_v20, %v663_v0  ;;  %v687_v35 = vadd.f32 %v686_v62, %v685_v4 }
 0x13f   :  { %v727_v39 = vrot.slane %v726_v15, 4  ;;  %v712_v38 = vadd.f32 %v711_v28, %v710_v25  ;;  %v778_v52 = vsel %vm777_vm2, %v624_v6, %v776_v10  ;;  %v705_v60 = vadd.f32 %v704_v11, %v703_v2  ;;  %v967_v6 = vld [vmem:[%s2071_s11 + $0x8] sm:$0xff]  ;;  %v964_v10 = vld [vmem:[#allocation11 + $0x10] sm:$0xff] }
 0x140   :  { %v733_v16 = vsel %vm167_vm0, %v596_v31, 0.0  ;;  %v641_v31 = vrot.slane %v640_v5, 1  ;;  %v666_v12 = vrot.slane %v665_v32, 2  ;;  %v789_v54 = vsel %vm775_vm1, %v687_v35, %v678_v34 }
 0x141   :  { %v735_v18 = vadd.f32 %v734_v1, %v733_v16  ;;  %v728_v33 = vadd.f32 %v727_v39, %v726_v15  ;;  %v713_v57 = vrot.slane %v712_v38, 1  ;;  %v790_v16 = vsel %vm777_vm2, %v696_v49, %v789_v54  ;;  %v1130_v49 = vld [vmem:[#allocation13] sm:$0xff] }
 0x142   :  { %v642_v58 = vadd.f32 %v641_v31, %v640_v5  ;;  %v667_v0 = vadd.f32 %v666_v12, %v665_v32  ;;  %v780_v1 = vsel %vm779_vm3, %v633_v48, %v778_v52  ;;  %v659_v21 = vrot.slane %v658_v55, 1  ;;  %v1131_v12 = vld [vmem:[#allocation13 + $0x8] sm:$0xff] }
 0x143   :  { %v736_v7 = vrot.slane %v735_v18, 4  ;;  %v729_v51 = vrot.slane %v728_v33, 2  ;;  %v722_v4 = vrot.slane %v721_v44, 1  ;;  %v651_v13 = vadd.f32 %v650_v45, %v649_v46  ;;  %v965_v46 = vld [vmem:[#allocation11 + $0x18] sm:$0xff] }
 0x144   :  { %v714_v22 = vadd.f32 %v713_v57, %v712_v38  ;;  %v791_v41 = vsel %vm779_vm3, %v705_v60, %v790_v16  ;;  %v782_v63 = vsel %vm781_vm4, %v642_v58, %v780_v1  ;;  %v668_v25 = vrot.slane %v667_v0, 1  ;;  %v1133_v45 = vld [vmem:[#allocation13 + $0x18] sm:$0xff] }
 0x145   :  { %v737_v29 = vadd.f32 %v736_v7, %v735_v18  ;;  %v730_v15 = vadd.f32 %v729_v51, %v728_v33  ;;  %v660_v3 = vadd.f32 %v659_v21, %v658_v55  ;;  %v723_v14 = vadd.f32 %v722_v4, %v721_v44  ;;  %v1132_v44 = vld [vmem:[#allocation13 + $0x10] sm:$0xff] }
 0x146   :  { %v784_v18 = vsel %vm783_vm5, %v651_v13, %v782_v63  ;;  %v792_v19 = vsel %vm781_vm4, %v714_v22, %v791_v41  ;;  %v669_v39 = vadd.f32 %v668_v25, %v667_v0  ;;  %v1417_v54 = vpack.c.bf16 %v1131_v12, %v1130_v49  ;;  %v1279_v0 = vld [vmem:[%s2073_s13] ss:$0 sm:$0xff] }
 0x147   :  { %v738_v61 = vrot.slane %v737_v29, 2  ;;  %v731_v17 = vrot.slane %v730_v15, 1  ;;  %v786_v62 = vsel %vm785_vm6, %v660_v3, %v784_v18  ;;  %v793_v27 = vsel %vm783_vm5, %v723_v14, %v792_v19 }
 0x148   :  { %v788_v23 = vsel %vm787_vm8, %v669_v39, %v786_v62 }
 0x149   :  { %v739_v9 = vadd.f32 %v738_v61, %v737_v29  ;;  %v732_v20 = vadd.f32 %v731_v17, %v730_v15  ;;  %v1413_v29 = vpack.c.bf16 %v965_v46, %v964_v10  ;;  %v1421_v61 = vpack.c.bf16 %v1133_v45, %v1132_v44 }
 0x14b   :  { %v740_v40 = vrot.slane %v739_v9, 1  ;;  %v794_v24 = vsel %vm785_vm6, %v732_v20, %v793_v27 }
 0x14d   :  { %v741_v59 = vadd.f32 %v740_v40, %v739_v9 }
 0x14f   :  { %v795_v28 = vsel %vm787_vm8, %v741_v59, %v794_v24 }
 0x16a   :  { %v744_v7 = vpop.xlane.xlu0 %743 }
 0x16e   :  { %v259_v34 = vpop.xlane.xlu0 %258 }
 0x16f   :  { %v274_v36 = vmul.f32 %v1265_v30, %v259_v34 }
 0x172   :  { %v262_v51 = vpop.xlane.xlu0 %261 }
 0x173   :  { %v275_v52 = vmul.f32 %v1265_v30, %v262_v51 }
 0x175   :  { %v747_v8 = vpop.xlane.xlu1 %746 }
 0x179   :  { %v1231_v22 = vpop.permute.xlu1 %1230 }
 0x17a   :  { %v1236_v41 = vpop.permute.xlu0 %1235 }
 0x1dd   :  { %v1322_v26 = vpop.f32.mrb[0].mxu0 }
 0x1de   :  { %v240_v47 = vpop.f32.mrb[1].mxu0 }
 0x1df   :  { %1331 = vmatprep.mubr.msk.f32.mxu0 %vm276_vm7, %v240_v47 }
 0x1e0   :  { %1332 = vmatmul.mubr.msk.f32.vlgmr.msra.gmra.mrb[2].mxu0 %vm276_vm7, %v1322_v26 }
 0x1e1   :  { %1396 = vmatpush3.bf16.msra.mxu0 %v1917_v56  ;;  %1338 = vmatprep.mubr.msk.f32.mxu0 %vm167_vm0, %v788_v23  ;;  %v966_v56 = vld [vmem:[%s2071_s11] sm:$0xff]  ;;  %s1638_s11 = smov [#allocation14]  }
 0x1e2   :  { %1398 = vmatprep.subr.bf16.mxu0 %v1901_v50  ;;  %v1405_v5 = vpack.c.bf16 %v967_v6, %v966_v56  ;;  %s1247_s8 = sshll.u32 %s1638_s11, 4  ;;  %s1248_s8 = int_to_ptr.vmem [resolvable:$true] %s1247_s8 }
 0x1e3   :  { %s1596_s5 = scalar_lea.vmem %s1248_s8, 256  ;;  %p1601_p1 = scmp.lt.s32.totalorder %s1248_s8, %s1248_s8 }
 0x1e4   :  { %1339 = vmatmul.mubr.msk.f32.vlgmr.msra.gmra.mrb[4].mxu0 %vm167_vm0, %v795_v28  ;;  %1406 = vmatprep.subr.bf16.mxu1 %v1405_v5  ;;  %p1597_p0 = scmp.ne.s32.totalorder %s1248_s8, %s1596_s5  ;;  %p1602_p2 = scmp.lt.s32.totalorder %s1596_s5, %s1596_s5 }
 0x1e5   :  { %1400 = vmatpush3.bf16.msra.mxu0 %v1901_v50  ;;  %1349 = vmatprep.mubr.msk.f32.mxu0 %vm276_vm7, %v1889_v42  ;;  %v962_v50 = vld [vmem:[#allocation11] sm:$0xff]  ;;  %v963_v42 = vld [vmem:[#allocation11 + $0x8] sm:$0xff] }
 0x1e6   :  { %1402 = vmatprep.subr.bf16.mxu0 %v1910_v53  ;;  %1408 = vmatpush3.bf16.msra.mxu1 %v1405_v5  ;;  %v1409_v2 = vpack.c.bf16 %v963_v42, %v962_v50  ;;  %p1603_p3 = por %p1602_p2, %p1601_p1 }
 0x1e8   :  { %1410 = vmatprep.subr.bf16.mxu1 %v1409_v2  ;;  %p1604_p4 = pnand %p1603_p3, %p1597_p0 }
 0x1e9   :  { %1404 = vmatpush3.bf16.msra.mxu0 %v1910_v53 }
 0x1ec   :  { %1350 = vmatmul.mubr.msk.f32.vlgmr.msra.gmra.mrb[6].mxu0 %vm276_vm7, %v1891_v43  ;;  %v1268_v43 = vld [vmem:[%s2069_s9] ss:$0 sm:$0xff] }
 0x1ed   :  { %v757_v33 = vmul.f32 %v1268_v43, %v744_v7  ;;  %v758_v35 = vmul.f32 %v1268_v43, %v747_v8 }
 0x2b3   :  { %v1333_v53 = vpop.f32.mrb[2].mxu0 }
 0x2b4   :  { %v349_v32 = vpop.f32.mrb[3].mxu0  ;;  %v355_v60 = vadd.f32 %v1333_v53, %v275_v52 }
 0x2b5   :  { %v350_v48 = vadd.f32 %v349_v32, %v274_v36 }
 0x2b7   :  { %v1340_v37 = vpop.f32.mrb[4].mxu0 }
 0x2b8   :  { %v866_v38 = vpop.f32.mrb[5].mxu0  ;;  %v872_v11 = vadd.f32 %v1340_v37, %v758_v35 }
 0x2b9   :  { %v867_v31 = vadd.f32 %v866_v38, %v757_v33 }
 0x2bb   :  { %1356 = vmatprep.mubr.msk.f32.mxu1 %vm167_vm0, %v867_v31 }
 0x2bc   :  { %1357 = vmatmul.mubr.msk.f32.vlgmr.msra.gmra.mrb[0].mxu1 %vm167_vm0, %v872_v11 }
 0x2bd   :  { %1412 = vmatpush3.bf16.msra.mxu1 %v1409_v2  ;;  %1367 = vmatprep.mubr.msk.f32.mxu1 %vm276_vm7, %v350_v48 }
 0x2be   :  { %1414 = vmatprep.subr.bf16.mxu1 %v1413_v29 }
 0x2bf   :  { %v1351_v55 = vpop.f32.mrb[6].mxu0 }
 0x2c0   :  { %v953_v57 = vpop.f32.mrb[7].mxu0  ;;  %v959_v16 = vadd.f32 %v1351_v55, %v1265_v30 }
 0x2c1   :  { %1416 = vmatpush3.bf16.msra.mxu1 %v1413_v29  ;;  %v954_v58 = vadd.f32 %v1265_v30, %v953_v57 }
 0x2c2   :  { %1418 = vmatprep.subr.bf16.mxu1 %v1417_v54 }
 0x2c4   :  { %1368 = vmatmul.mubr.msk.f32.vlgmr.msra.gmra.mrb[0].mxu1 %vm276_vm7, %v355_v60 }
 0x2c5   :  { %1420 = vmatpush3.bf16.msra.mxu1 %v1417_v54  ;;  %1378 = vmatprep.mubr.msk.f32.mxu1 %vm276_vm7, %v954_v58 }
 0x2c6   :  { %1422 = vmatprep.subr.bf16.mxu1 %v1421_v61 }
 0x2c9   :  { %1424 = vmatpush3.bf16.msra.mxu1 %v1421_v61 }
 0x2cc   :  { %1379 = vmatmul.mubr.msk.f32.vlgmr.msra.gmra.mrb[0].mxu1 %vm276_vm7, %v959_v16 }
 0x39f   :  { %v1380_v15 = vpop.f32.mrb[0].mxu1 }
 0x3a0   :  { %v1225_v1 = vadd.f32 %v1380_v15, %v1279_v0  ;;  %v1206_v21 = vpop.f32.mrb[1].mxu1 }
 0x3a1   :  { %v1224_v4 = vadd.f32 %v1279_v0, %v1206_v21 }
 0x3a2   :  { %v1227_v13 = vmax.f32 %v1225_v1, 0.0 }
 0x3a3   :  { %v1226_v9 = vmax.f32 %v1224_v4, 0.0 }
 0x3a4   :  { %v1239_v63 = vmul.f32 %v1236_v41, %v1227_v13 }
 0x3a5   :  { %v1238_v25 = vmul.f32 %v1231_v22, %v1226_v9 }
 0x3a6   :  { %1241 = vst.msk [vmem:[#allocation14 + $0x8] sm:$0xff] %vm276_vm7, %v1239_v63 }
 0x3a7   :  { %1240 = vst.msk [vmem:[#allocation14] sm:$0xff] %vm276_vm7, %v1238_v25 }
 0x3a8   :  { %1607 = shalt.err (!%p1604_p4)
}
 0x3a9   :  { %s1608_s24 = scalar_lea.hbm %s2074_s14, 256 }
 0x3aa   :  { %p1609_p5 = scmp.ne.s32.totalorder %s2074_s14, %s1608_s24  ;;  %p1612_p6 = scmp.lt.u32.totalorder %s1608_s24, %s2074_s14 }
 0x3ac   :  { %p1614_p7 = pnand %p1612_p6, %p1609_p5 }
 0x3ae   :  { %1617 = shalt.err (!%p1614_p7)
}
 0x3af   :  { %1253 = dma.vmem_to_hbm [thread:$0]  %s1248_s8, 256, %s2074_s14, [#allocation4], %s1630_s25, %s1630_s25, %s1631_s26  }
 0x3b0   :  { %1626 = dma.done.wait [#allocation4], 256  }
 0x3b1   :  { %1627 = vsyncadd [#allocation4], 4294967040 }
 0x3b2   :  { %1257 = vsyncpa [#allocation3], 1 }
 0x3b3   :  { %1258 = vsyncpa [#allocation6], 1 }
 0x3b4   :  { %1259 = vsyncpa [#allocation9], 1 }
 0x3b5   :  { %1260 = vsyncpa [#allocation12], 1 }
 0x3b6   :  { %1261 = vsyncpa [#allocation4], 1 }

</bundles_post_ra>
